<compile_context>
chip_gen: v6e
topology: v6e:2x2x1
jax: 0.10.0
libtpu: 0.0.40
codegen_flags: <defaults>
</compile_context>

<pallas_src>
import functools

import jax
import jax.numpy as jnp
from jax.experimental import pallas as pl
from jax.experimental.pallas import tpu as pltpu


# --------------------------------------------------------------------------
# Kernels
# --------------------------------------------------------------------------
def br_fused_kernel(x_ref, gamma_ref, beta_ref, alpha_ref, o_ref, *, count, eps):
    """Single-launch path: x resident in VMEM, stats + normalize + PReLU.

    x_ref:  (N, C, HW)     o_ref: (N, C, HW)
    gamma_ref / beta_ref / alpha_ref: (1, C, 1)
    """
    x = x_ref[...].astype(jnp.float32)
    s = x.sum(axis=2, keepdims=True).sum(axis=0, keepdims=True)          # (1,C,1)
    sq = (x * x).sum(axis=2, keepdims=True).sum(axis=0, keepdims=True)   # (1,C,1)
    inv_n = 1.0 / count
    mean = s * inv_n
    var = jnp.maximum(sq * inv_n - mean * mean, 0.0)                     # biased
    inv = jax.lax.rsqrt(var + eps)
    scale = gamma_ref[...] * inv
    shift = beta_ref[...] - mean * scale
    y = x * scale + shift
    o_ref[...] = jnp.where(y >= 0.0, y, alpha_ref[...] * y).astype(o_ref.dtype)


def bn_stats_kernel(x_ref, sum_ref, sumsq_ref, *, valid_cols, block_cols):
    """Pass 1: per-row (i.e. per-(n,c)) sum and sum-of-squares.

    x_ref:     (TR, TL)  lane-dense activation tile
    sum_ref:   (TR, 1)   grid-resident accumulator
    sumsq_ref: (TR, 1)   grid-resident accumulator
    """
    c_idx = pl.program_id(1)

    @pl.when(c_idx == 0)
    def _init():
        sum_ref[...] = jnp.zeros_like(sum_ref)
        sumsq_ref[...] = jnp.zeros_like(sumsq_ref)

    x = x_ref[...].astype(jnp.float32)
    if valid_cols % block_cols != 0:
        # Ragged last column tile: zero out-of-range lanes before reducing.
        col = jax.lax.broadcasted_iota(jnp.int32, x.shape, 1) + c_idx * block_cols
        x = jnp.where(col < valid_cols, x, 0.0)
    sum_ref[...] += jnp.sum(x, axis=1, keepdims=True)
    sumsq_ref[...] += jnp.sum(x * x, axis=1, keepdims=True)


def bn_prelu_kernel(x_ref, scale_ref, shift_ref, alpha_ref, o_ref):
    """Pass 2: y = x * scale + shift ; PReLU(y), per-row parameters.

    x_ref: (TR, TL)   scale/shift/alpha: (TR, 1)   o_ref: (TR, TL)
    """
    x = x_ref[...].astype(jnp.float32)
    y = x * scale_ref[...] + shift_ref[...]
    o_ref[...] = jnp.where(y >= 0.0, y, alpha_ref[...] * y).astype(o_ref.dtype)


# --------------------------------------------------------------------------
# Wrapper-side sizing helpers
# --------------------------------------------------------------------------
def _round_up(x, m):
    return ((x + m - 1) // m) * m


def _round_down(x, m):
    return (x // m) * m


def _vmem_capacity_bytes():
    try:
        return int(pltpu.get_tpu_info().vmem_capacity_bytes)
    except Exception:
        return 128 * 1024 * 1024  # v5e/v6e default if query unavailable


def _budgets():
    mib = 1024 * 1024
    cap = _vmem_capacity_bytes()
    small = cap <= 96 * mib            # v7x: 64 MiB per TensorCore
    if small:
        return dict(pass2_block=6 * mib, pass1_block=12 * mib,
                    fused_x=8 * mib, vmem_limit=min(48 * mib, (cap * 3) // 4))
    return dict(pass2_block=12 * mib, pass1_block=24 * mib,
                fused_x=16 * mib, vmem_limit=min(96 * mib, (cap * 3) // 4))


def _pick_tiles(rows, cols, itemsize, budget):
    """(row_tile, col_tile) sized by bytes; lane tile multiple of 128 (or full),
    row tile multiple of 8 (or full) so sublanes stay filled."""
    if cols <= 128 or cols * itemsize * 8 <= budget:
        tl = cols                                       # full, contiguous rows
    else:
        tl = max(128, _round_down(budget // (8 * itemsize), 128))
        tl = min(tl, _round_up(cols, 128))
    tr = budget // (tl * itemsize)
    if tr >= rows:
        tr = rows
    else:
        tr = max(8, _round_down(tr, 8))
        if tr >= rows:
            tr = rows
    return tr, tl


# --------------------------------------------------------------------------
# Forward
# --------------------------------------------------------------------------
def br_forward(x_nchw, gamma, beta, alpha, *, eps=1e-5,
               force_two_pass=False, block_budget_override=None):
    """BR.forward: NCHW in, NCHW out (matches the PyTorch module)."""
    N, C, H, W = x_nchw.shape
    HW = H * W
    R = N * C
    itemsize = jnp.dtype(x_nchw.dtype).itemsize
    cfg = _budgets()
    if block_budget_override is not None:
        cfg = dict(cfg, pass1_block=block_budget_override,
                   pass2_block=block_budget_override)

    def cparams(sem):
        return pltpu.CompilerParams(dimension_semantics=sem,
                                    vmem_limit_bytes=cfg["vmem_limit"])

    # ---------- Fused small-shape path: 1 read + 1 write of x ----------
    if (not force_two_pass) and (N * C * HW * 4 <= cfg["fused_x"]):
        x3 = x_nchw.reshape(N, C, HW)                       # free reshape
        g3 = gamma.astype(jnp.float32).reshape(1, C, 1)
        b3 = beta.astype(jnp.float32).reshape(1, C, 1)
        a3 = alpha.astype(jnp.float32).reshape(1, C, 1)
        y3 = pl.pallas_call(
            functools.partial(br_fused_kernel,
                              count=float(N * HW), eps=float(eps)),
            out_shape=jax.ShapeDtypeStruct((N, C, HW), x_nchw.dtype),
            grid=(1,),
            in_specs=[pl.BlockSpec((N, C, HW), lambda i: (0, 0, 0)),
                      pl.BlockSpec((1, C, 1), lambda i: (0, 0, 0)),
                      pl.BlockSpec((1, C, 1), lambda i: (0, 0, 0)),
                      pl.BlockSpec((1, C, 1), lambda i: (0, 0, 0))],
            out_specs=pl.BlockSpec((N, C, HW), lambda i: (0, 0, 0)),
            compiler_params=cparams(("arbitrary",)),
        )(x3, g3, b3, a3)
        return y3.reshape(N, C, H, W)

    # ---------- Two-pass path (large shapes) ----------
    x2d = x_nchw.reshape(R, HW)                             # free reshape, native layout

    # Pass 1: per-(n,c) statistics.
    tr1, tl1 = _pick_tiles(R, HW, itemsize, cfg["pass1_block"])
    grid1 = (pl.cdiv(R, tr1), pl.cdiv(HW, tl1))
    row_sum, row_sumsq = pl.pallas_call(
        functools.partial(bn_stats_kernel, valid_cols=HW, block_cols=tl1),
        out_shape=(jax.ShapeDtypeStruct((R, 1), jnp.float32),
                   jax.ShapeDtypeStruct((R, 1), jnp.float32)),
        grid=grid1,
        in_specs=[pl.BlockSpec((tr1, tl1), lambda r, c: (r, c))],
        out_specs=(pl.BlockSpec((tr1, 1), lambda r, c: (r, 0)),
                   pl.BlockSpec((tr1, 1), lambda r, c: (r, 0))),
        compiler_params=cparams(("parallel", "arbitrary")),
    )(x2d)

    # Tiny per-channel math in plain JAX: fold (N,C) partials over N and turn
    # BatchNorm into per-row scale/shift (a few KB of traffic at most).
    cnt = jnp.float32(N * HW)
    ch_sum = row_sum.reshape(N, C).sum(axis=0)
    ch_sumsq = row_sumsq.reshape(N, C).sum(axis=0)
    mean = ch_sum / cnt
    var = jnp.maximum(ch_sumsq / cnt - mean * mean, 0.0)     # biased (training BN)
    inv = jax.lax.rsqrt(var + eps)
    scale_c = gamma.astype(jnp.float32) * inv
    shift_c = beta.astype(jnp.float32) - mean * scale_c
    scale = jnp.tile(scale_c, N).reshape(R, 1)               # row index = n*C + c
    shift = jnp.tile(shift_c, N).reshape(R, 1)
    alpha_r = jnp.tile(alpha.astype(jnp.float32), N).reshape(R, 1)

    # Pass 2: normalize + PReLU, fully parallel, output written in-place layout.
    tr2, tl2 = _pick_tiles(R, HW, itemsize, cfg["pass2_block"])
    grid2 = (pl.cdiv(R, tr2), pl.cdiv(HW, tl2))
    y2d = pl.pallas_call(
        bn_prelu_kernel,
        out_shape=jax.ShapeDtypeStruct((R, HW), x_nchw.dtype),
        grid=grid2,
        in_specs=[pl.BlockSpec((tr2, tl2), lambda r, c: (r, c)),
                  pl.BlockSpec((tr2, 1), lambda r, c: (r, 0)),
                  pl.BlockSpec((tr2, 1), lambda r, c: (r, 0)),
                  pl.BlockSpec((tr2, 1), lambda r, c: (r, 0))],
        out_specs=pl.BlockSpec((tr2, tl2), lambda r, c: (r, c)),
        compiler_params=cparams(("parallel", "parallel")),
    )(x2d, scale, shift, alpha_r)
    return y2d.reshape(N, C, H, W)


# --------------------------------------------------------------------------
# Reference + test
# --------------------------------------------------------------------------
def _reference(x_nchw, gamma, beta, alpha, *, eps=1e-5):
    """Pure-JAX reference: training-mode BatchNorm2d + per-channel PReLU."""
    mean = jnp.mean(x_nchw, axis=(0, 2, 3), keepdims=True)
    var = jnp.var(x_nchw, axis=(0, 2, 3), keepdims=True)     # biased
    g = gamma.reshape(1, -1, 1, 1)
    b = beta.reshape(1, -1, 1, 1)
    a = alpha.reshape(1, -1, 1, 1)
    y = (x_nchw - mean) * jax.lax.rsqrt(var + eps) * g + b
    return jnp.where(y >= 0.0, y, a * y)


if __name__ == "__main__":
    key = jax.random.PRNGKey(0)
    kx, kg, kb, kx2 = jax.random.split(key, 4)

    # Small shapes consistent with the module: BR(nOut=4) on a (2,4,16,16) map.
    N, C, H, W = 2, 4, 16, 16
    x = jax.random.normal(kx, (N, C, H, W), dtype=jnp.float32)
    gamma = 1.0 + 0.1 * jax.random.normal(kg, (C,), dtype=jnp.float32)
    beta = 0.1 * jax.random.normal(kb, (C,), dtype=jnp.float32)
    alpha = 0.25 * jnp.ones((C,), jnp.float32)                # nn.PReLU default init

    ref = _reference(x, gamma, beta, alpha)

    # 1) Default dispatch: small shape takes the fused single-launch path.
    out = jax.block_until_ready(br_forward(x, gamma, beta, alpha))
    assert out.shape == (N, C, H, W)
    assert jnp.allclose(out, ref, atol=1e-3, rtol=1e-3)

    # 2) Force the large-shape two-pass path on the same data.
    out2 = jax.block_until_ready(
        br_forward(x, gamma, beta, alpha, force_two_pass=True))
    assert jnp.allclose(out2, ref, atol=1e-3, rtol=1e-3)

    # 3) Exercise ragged column tiles + in-kernel tail masking (H*W not a
    #    multiple of the lane tile) with a tiny forced block budget.
    xr = jax.random.normal(kx2, (N, C, 15, 15), dtype=jnp.float32)
    out3 = jax.block_until_ready(
        br_forward(xr, gamma, beta, alpha, force_two_pass=True,
                   block_budget_override=4096))
    assert jnp.allclose(out3, _reference(xr, gamma, beta, alpha),
                        atol=1e-3, rtol=1e-3)

    print("KERNEL_OK")
</pallas_src>

<mosaic_0001>
module attributes {stable_mosaic.version = 11 : i64} {
  func.func @br_fused_kernel(%arg0: i32, %arg1: memref<2x4x256xf32, #tpu.memory_space<vmem>>, %arg2: memref<1x4x1xf32, #tpu.memory_space<vmem>>, %arg3: memref<1x4x1xf32, #tpu.memory_space<vmem>>, %arg4: memref<1x4x1xf32, #tpu.memory_space<vmem>>, %arg5: memref<2x4x256xf32, #tpu.memory_space<vmem>>) attributes {dimension_semantics = [#tpu.dimension_semantics<arbitrary>], iteration_bounds = array<i64: 1>, scalar_prefetch = 0 : i64, scratch_operands = 0 : i64, tpu.core_type = #tpu.core_type<tc>, window_params = [{pipeline_mode = #tpu.pipeline_mode<synchronous>, transform_indices = @transform_0, window_bounds = array<i64: 2, 4, 256>}, {pipeline_mode = #tpu.pipeline_mode<synchronous>, transform_indices = @transform_1, window_bounds = array<i64: 1, 4, 1>}, {pipeline_mode = #tpu.pipeline_mode<synchronous>, transform_indices = @transform_2, window_bounds = array<i64: 1, 4, 1>}, {pipeline_mode = #tpu.pipeline_mode<synchronous>, transform_indices = @transform_3, window_bounds = array<i64: 1, 4, 1>}, {pipeline_mode = #tpu.pipeline_mode<synchronous>, transform_indices = @transform_4, window_bounds = array<i64: 2, 4, 256>}]} {
    %c0 = arith.constant 0 : index
    %c0_0 = arith.constant 0 : index
    %c0_1 = arith.constant 0 : index
    %0 = vector.load %arg1[%c0, %c0_0, %c0_1] : memref<2x4x256xf32, #tpu.memory_space<vmem>>, vector<2x4x256xf32>
    %cst = arith.constant dense<0.000000e+00> : vector<2x4xf32>
    %1 = vector.multi_reduction <add>, %0, %cst [2] : vector<2x4x256xf32> to vector<2x4xf32>
    %2 = vector.shape_cast %1 : vector<2x4xf32> to vector<2x4x1xf32>
    %cst_2 = arith.constant dense<0.000000e+00> : vector<4x1xf32>
    %3 = vector.multi_reduction <add>, %2, %cst_2 [0] : vector<2x4x1xf32> to vector<4x1xf32>
    %4 = vector.shape_cast %3 : vector<4x1xf32> to vector<1x4x1xf32>
    %5 = arith.mulf %0, %0 : vector<2x4x256xf32>
    %cst_3 = arith.constant dense<0.000000e+00> : vector<2x4xf32>
    %6 = vector.multi_reduction <add>, %5, %cst_3 [2] : vector<2x4x256xf32> to vector<2x4xf32>
    %7 = vector.shape_cast %6 : vector<2x4xf32> to vector<2x4x1xf32>
    %cst_4 = arith.constant dense<0.000000e+00> : vector<4x1xf32>
    %8 = vector.multi_reduction <add>, %7, %cst_4 [0] : vector<2x4x1xf32> to vector<4x1xf32>
    %9 = vector.shape_cast %8 : vector<4x1xf32> to vector<1x4x1xf32>
    %cst_5 = arith.constant 0.001953125 : f32
    %10 = vector.broadcast %cst_5 : f32 to vector<1x4x1xf32>
    %11 = arith.mulf %4, %10 : vector<1x4x1xf32>
    %cst_6 = arith.constant 0.001953125 : f32
    %12 = vector.broadcast %cst_6 : f32 to vector<1x4x1xf32>
    %13 = arith.mulf %9, %12 : vector<1x4x1xf32>
    %14 = arith.mulf %11, %11 : vector<1x4x1xf32>
    %15 = arith.subf %13, %14 : vector<1x4x1xf32>
    %cst_7 = arith.constant 0.000000e+00 : f32
    %16 = vector.broadcast %cst_7 : f32 to vector<1x4x1xf32>
    %17 = arith.maximumf %15, %16 : vector<1x4x1xf32>
    %cst_8 = arith.constant 9.99999974E-6 : f32
    %18 = vector.broadcast %cst_8 : f32 to vector<1x4x1xf32>
    %19 = arith.addf %17, %18 : vector<1x4x1xf32>
    %20 = math.rsqrt %19 : vector<1x4x1xf32>
    %c0_9 = arith.constant 0 : index
    %c0_10 = arith.constant 0 : index
    %c0_11 = arith.constant 0 : index
    %21 = vector.load %arg2[%c0_9, %c0_10, %c0_11] : memref<1x4x1xf32, #tpu.memory_space<vmem>>, vector<1x4x1xf32>
    %22 = arith.mulf %21, %20 : vector<1x4x1xf32>
    %c0_12 = arith.constant 0 : index
    %c0_13 = arith.constant 0 : index
    %c0_14 = arith.constant 0 : index
    %23 = vector.load %arg3[%c0_12, %c0_13, %c0_14] : memref<1x4x1xf32, #tpu.memory_space<vmem>>, vector<1x4x1xf32>
    %24 = arith.mulf %11, %22 : vector<1x4x1xf32>
    %25 = arith.subf %23, %24 : vector<1x4x1xf32>
    %26 = vector.broadcast %22 : vector<1x4x1xf32> to vector<2x4x256xf32>
    %27 = arith.mulf %0, %26 : vector<2x4x256xf32>
    %28 = vector.broadcast %25 : vector<1x4x1xf32> to vector<2x4x256xf32>
    %29 = arith.addf %27, %28 : vector<2x4x256xf32>
    %cst_15 = arith.constant 0.000000e+00 : f32
    %30 = vector.broadcast %cst_15 : f32 to vector<2x4x256xf32>
    %31 = arith.cmpf oge, %29, %30 : vector<2x4x256xf32>
    %c0_16 = arith.constant 0 : index
    %c0_17 = arith.constant 0 : index
    %c0_18 = arith.constant 0 : index
    %32 = vector.load %arg4[%c0_16, %c0_17, %c0_18] : memref<1x4x1xf32, #tpu.memory_space<vmem>>, vector<1x4x1xf32>
    %33 = vector.broadcast %32 : vector<1x4x1xf32> to vector<2x4x256xf32>
    %34 = arith.mulf %33, %29 : vector<2x4x256xf32>
    %35 = arith.select %31, %29, %34 : vector<2x4x256xi1>, vector<2x4x256xf32>
    %c0_19 = arith.constant 0 : index
    %c0_20 = arith.constant 0 : index
    %c0_21 = arith.constant 0 : index
    %36 = vector.load %arg5[%c0_19, %c0_20, %c0_21] : memref<2x4x256xf32, #tpu.memory_space<vmem>>, vector<2x4x256xf32>
    tpu.vector_store %arg5[%c0_19, %c0_20, %c0_21], %35 {strides = array<i32>} : memref<2x4x256xf32, #tpu.memory_space<vmem>>, vector<2x4x256xf32>,
    return
  }
  func.func @transform_0(%arg0: i32) -> (i32, i32, i32) {
    %c0_i32 = arith.constant 0 : i32
    %c0_i32_0 = arith.constant 0 : i32
    %c0_i32_1 = arith.constant 0 : i32
    %c0_i32_2 = arith.constant 0 : i32
    return %c0_i32, %c0_i32_0, %c0_i32_1 : i32, i32, i32
  }
  func.func @transform_1(%arg0: i32) -> (i32, i32, i32) {
    %c0_i32 = arith.constant 0 : i32
    %c0_i32_0 = arith.constant 0 : i32
    %c0_i32_1 = arith.constant 0 : i32
    %c0_i32_2 = arith.constant 0 : i32
    return %c0_i32, %c0_i32_0, %c0_i32_1 : i32, i32, i32
  }
  func.func @transform_2(%arg0: i32) -> (i32, i32, i32) {
    %c0_i32 = arith.constant 0 : i32
    %c0_i32_0 = arith.constant 0 : i32
    %c0_i32_1 = arith.constant 0 : i32
    %c0_i32_2 = arith.constant 0 : i32
    return %c0_i32, %c0_i32_0, %c0_i32_1 : i32, i32, i32
  }
  func.func @transform_3(%arg0: i32) -> (i32, i32, i32) {
    %c0_i32 = arith.constant 0 : i32
    %c0_i32_0 = arith.constant 0 : i32
    %c0_i32_1 = arith.constant 0 : i32
    %c0_i32_2 = arith.constant 0 : i32
    return %c0_i32, %c0_i32_0, %c0_i32_1 : i32, i32, i32
  }
  func.func @transform_4(%arg0: i32) -> (i32, i32, i32) {
    %c0_i32 = arith.constant 0 : i32
    %c0_i32_0 = arith.constant 0 : i32
    %c0_i32_1 = arith.constant 0 : i32
    %c0_i32_2 = arith.constant 0 : i32
    return %c0_i32, %c0_i32_0, %c0_i32_1 : i32, i32, i32
  }
}

</mosaic_0001>

<bundles_post_ra>
// kernel: tpu_custom_call.1
= control target key start
LH: loop header
LB: loop body
LE: loop exit
PB: predicated region body
PF: predicated region fallthrough
CT: control target
= control target key end

     0   :  { %9 = vsyncpa [#allocation3], 0  ;;  %s298_s0 = inlined_call_operand.hbm [shape: f32[2,4,256], index: 0, kind: input, shape index: {}]   ;;  %s299_s1 = inlined_call_operand.vmem [shape: f32[1,4,1], index: 1, kind: input, shape index: {}]   ;;  %s300_s2 = inlined_call_operand.vmem [shape: f32[1,4,1], index: 2, kind: input, shape index: {}]   ;;  %s301_s3 = inlined_call_operand.vmem [shape: f32[1,4,1], index: 3, kind: input, shape index: {}]   ;;  %s302_s4 = inlined_call_operand.hbm [shape: f32[2,4,256], index: 4, kind: output, shape index: {}]  }
   0x1   :  { %10 = vsyncpa [#allocation4], 0  ;;  %s218_s15 = smov [#allocation2]  }
   0x2   :  { %s16_s16 = sshll.u32 %s218_s15, 4  ;;  %s17_s16 = int_to_ptr.vmem [resolvable:$true] %s16_s16 }
   0x3   :  { %s182_s17 = scalar_lea.vmem %s17_s16, 256  ;;  %p187_p1 = scmp.lt.s32.totalorder %s17_s16, %s17_s16 }
   0x4   :  { %p183_p0 = scmp.ne.s32.totalorder %s17_s16, %s182_s17  ;;  %p188_p2 = scmp.lt.s32.totalorder %s182_s17, %s182_s17 }
   0x6   :  { %p189_p3 = por %p188_p2, %p187_p1 }
   0x8   :  { %p190_p4 = pnand %p189_p3, %p183_p0 }
   0xa   :  { %193 = shalt.err (!%p190_p4)
}
   0xb   :  { %s219_s18 = smov 128   ;;  %s220_s19 = smov 8  }
   0xc   :  { %22 = dma.hbm_to_vmem [thread:$0]  %s298_s0, 256, %s17_s16, [#allocation3], %s219_s18, %s219_s18, %s220_s19  }
   0xd   :  { %214 = dma.done.wait [#allocation3], 256  }
   0xe   :  { %215 = vsyncadd [#allocation3], 4294967040  ;;  %vm40_vm0 = vcmask 1043456   ;;  %v255_v0 = vld [vmem:[#allocation2] sm:$0xff]  ;;  %v257_v1 = vld [vmem:[#allocation2 + $0x8] sm:$0xff]  ;;  %v221_v20 = vmov 0   ;;  %v94_v46 = vlaneseq }
   0xf   :  { %v36_v2 = vcombine.high %v255_v0, %v255_v0  ;;  %v41_v3 = vsel %vm40_vm0, %v255_v0, 0.0  ;;  %v54_v4 = vmul.f32 %v255_v0, %v255_v0  ;;  %v37_v5 = vcombine.high %v257_v1, %v257_v1  ;;  %168 = vset.pattern.permute.xlu0 %v221_v20  ;;  %169 = vset.pattern.permute.xlu1 %v221_v20  ;;  %v82_v37 = vld [vmem:[%s299_s1] sm:$0xf]  ;;  %s223_s1 = smov [#allocation5]  }
  0x10   :  { %v46_v6 = vsel %vm40_vm0, %v257_v1, 0.0  ;;  %v55_v7 = vmul.f32 %v257_v1, %v257_v1  ;;  %v84_v40 = vld [vmem:[%s300_s2] sm:$0xf]  ;;  %v222_v44 = vmov 839922192   ;;  %v95_v48 = vshrl.u32 %v94_v46, 7 }
  0x11   :  { %v42_v8 = vsel %vm40_vm0, %v36_v2, 0.0  ;;  %v58_v9 = vcombine.high %v54_v4, %v54_v4  ;;  %v62_v10 = vsel %vm40_vm0, %v54_v4, 0.0  ;;  %v47_v11 = vsel %vm40_vm0, %v37_v5, 0.0  ;;  %v117_v43 = vld [vmem:[%s301_s3] sm:$0xf]  ;;  %s150_s2 = sshll.u32 %s223_s1, 4  ;;  %s151_s2 = int_to_ptr.vmem [resolvable:$true] %s150_s2 }
  0x12   :  { %v43_v12 = vadd.f32 %v42_v8, %v41_v3  ;;  %v59_v13 = vcombine.high %v55_v7, %v55_v7  ;;  %v67_v15 = vsel %vm40_vm0, %v55_v7, 0.0  ;;  %v48_v17 = vadd.f32 %v47_v11, %v46_v6  ;;  %s194_s3 = scalar_lea.vmem %s151_s2, 256  ;;  %p199_p6 = scmp.lt.s32.totalorder %s151_s2, %s151_s2 }
  0x13   :  { %v63_v14 = vsel %vm40_vm0, %v58_v9, 0.0  ;;  %v92_v45 = vunpack.c.l.s4 %v222_v44  ;;  %p195_p5 = scmp.ne.s32.totalorder %s151_s2, %s194_s3  ;;  %p200_p7 = scmp.lt.s32.totalorder %s194_s3, %s194_s3 }
  0x14   :  { %44 = vadd.xlane.f32.xlu0 %v43_v12  ;;  %v64_v16 = vadd.f32 %v63_v14, %v62_v10  ;;  %v68_v18 = vsel %vm40_vm0, %v59_v13, 0.0 }
  0x15   :  { %v69_v19 = vadd.f32 %v68_v18, %v67_v15  ;;  %v93_v47 = vunpack.c.0.s8 %v92_v45  ;;  %p201_p8 = por %p200_p7, %p199_p6 }
  0x16   :  { %65 = vadd.xlane.f32.xlu1 %v64_v16 }
  0x17   :  { %v96_v49 = vsub.s32 %v93_v47, %v95_v48  ;;  %p202_p9 = pnand %p201_p8, %p195_p5 }
  0x18   :  { %49 = vadd.xlane.f32.xlu0 %v48_v17 }
  0x1a   :  { %70 = vadd.xlane.f32.xlu1 %v69_v19 }
  0x9d   :  { %v45_v21 = vpop.xlane.xlu0 %44 }
  0x9e   :  { %v51_v24 = vsel %vm40_vm0, %v45_v21, 0.0 }
  0x9f   :  { %v66_v22 = vpop.xlane.xlu1 %65 }
  0xa0   :  { %v72_v28 = vsel %vm40_vm0, %v66_v22, 0.0 }
  0xa1   :  { %v50_v23 = vpop.xlane.xlu0 %49 }
  0xa2   :  { %v52_v25 = vsel %vm40_vm0, %v50_v23, 0.0 }
  0xa3   :  { %v53_v26 = vadd.f32 %v52_v25, %v51_v24  ;;  %v71_v27 = vpop.xlane.xlu1 %70 }
  0xa4   :  { %v73_v29 = vsel %vm40_vm0, %v71_v27, 0.0 }
  0xa5   :  { %v75_v30 = vmul.f32 0.001953125, %v53_v26  ;;  %v74_v31 = vadd.f32 %v73_v29, %v72_v28 }
  0xa7   :  { %v77_v32 = vmul.f32 %v75_v30, %v75_v30  ;;  %v76_v33 = vmul.f32 0.001953125, %v74_v31 }
  0xa9   :  { %v78_v34 = vsub.f32 %v76_v33, %v77_v32 }
  0xab   :  { %v79_v35 = vmax.f32 %v78_v34, 0.0 }
  0xad   :  { %v80_v36 = vadd.f32 1e-05, %v79_v35 }
  0xaf   :  { %172 = vrsqrt.f32 %v80_v36 }
  0xbc   :  { %v173_v38 = vpop.eup %172 }
  0xbd   :  { %v83_v39 = vmul.f32 %v173_v38, %v82_v37 }
  0xbf   :  { %89 = vperm.xlu0 %168, %v83_v39   ;;  %v85_v41 = vmul.f32 %v83_v39, %v75_v30 }
  0xc1   :  { %v86_v42 = vsub.f32 %v84_v40, %v85_v41 }
  0xc3   :  { %103 = vperm.xlu1 %169, %v86_v42  }
  0xc7   :  { %120 = vperm.xlu1 %169, %v117_v43  }
 0x13a   :  { %v90_v50 = vpop.permute.xlu0 %89 }
 0x13b   :  { %v97_v51 = vrot.slane %v90_v50, %v96_v49 }
 0x13d   :  { %v99_v53 = vmul.f32 %v97_v51, %v255_v0  ;;  %v100_v54 = vmul.f32 %v97_v51, %v257_v1 }
 0x13e   :  { %v104_v52 = vpop.permute.xlu1 %103 }
 0x13f   :  { %v111_v55 = vrot.slane %v104_v52, %v96_v49 }
 0x141   :  { %v113_v56 = vadd.f32 %v111_v55, %v99_v53  ;;  %v114_v57 = vadd.f32 %v111_v55, %v100_v54 }
 0x142   :  { %v121_v58 = vpop.permute.xlu1 %120 }
 0x143   :  { %v125_v59 = vcombine.high %v113_v56, %v113_v56  ;;  %v126_v60 = vcombine.high %v114_v57, %v114_v57  ;;  %v129_v61 = vmul.f32 %v121_v58, %v113_v56  ;;  %v131_v63 = vmul.f32 %v121_v58, %v114_v57 }
 0x144   :  { %vm115_vm1 = vcmp.ge.f32.partialorder %v113_v56, 0.0  ;;  %vm116_vm2 = vcmp.ge.f32.partialorder %v114_v57, 0.0 }
 0x145   :  { %v130_v62 = vmul.f32 %v125_v59, %v121_v58  ;;  %v132_v2 = vmul.f32 %v126_v60, %v121_v58 }
 0x147   :  { %v137_v3 = vcombine.low %v129_v61, %v130_v62  ;;  %v138_v4 = vcombine.low %v131_v63, %v132_v2 }
 0x149   :  { %v141_v0 = vsel %vm115_vm1, %v113_v56, %v137_v3  ;;  %v142_v5 = vsel %vm116_vm2, %v114_v57, %v138_v4 }
 0x14a   :  { %143 = vst [vmem:[#allocation5] sm:$0xff] %v141_v0  ;;  %144 = vst [vmem:[#allocation5 + $0x8] sm:$0xff] %v142_v5 }
 0x14b   :  { %205 = shalt.err (!%p202_p9)
}
 0x14c   :  { %156 = dma.vmem_to_hbm [thread:$0]  %s151_s2, 256, %s302_s4, [#allocation4], %s219_s18, %s219_s18, %s220_s19  }
 0x14d   :  { %216 = dma.done.wait [#allocation4], 256  }
 0x14e   :  { %217 = vsyncadd [#allocation4], 4294967040 }
 0x14f   :  { %160 = vsyncpa [#allocation3], 1 }
 0x150   :  { %161 = vsyncpa [#allocation4], 1 }

</bundles_post_ra>
